<compile_context>
chip_gen: v5e
topology: v5e:2x2
jax: 0.10.0
libtpu: 0.0.40
codegen_flags: <defaults>
</compile_context>

<pallas_src>
import functools

import jax
import jax.numpy as jnp
from jax.experimental import pallas as pl
from jax.experimental.pallas import tpu as pltpu


def _patchify_kernel(x_ref, o_ref, *, n_w, ph, pw):
    """Per-row lane permutation: (C*nH, ph*nW*pw) slab -> (C*nH, nW*ph*pw) patch rows.

    Slab row b = (c, i).  Input lane  p*(nW*pw) + j*pw + q
                       -> output lane j*(ph*pw)  + p*pw + q.
    """
    slab = x_ref[...]                                   # one full, lane-dense load
    w_row = n_w * pw
    pieces = [
        slab[:, p * w_row + j * pw : p * w_row + (j + 1) * pw]   # (rows, pw)
        for j in range(n_w)
        for p in range(ph)
    ]
    o_ref[...] = jnp.concatenate(pieces, axis=-1)       # one full, unmasked store


def patch_transform_forward(x, *, num_patches, image_size):
    """JAX/Pallas equivalent of PatchTransform(num_patches, image_size).forward(x).

    x: (3, H, W) image. Returns (nH*nW, 3*ph*pw), bit-identical to the torch module.
    """
    if isinstance(image_size, int):
        h_img, w_img = image_size, image_size
    else:
        h_img, w_img = image_size
    # integer form of torch's int(H / (num_patches / 2)) (avoids FP rounding)
    ph = (2 * h_img) // num_patches
    pw = (2 * w_img) // num_patches

    C, H, W = x.shape
    assert C == 3, "PatchTransform.forward hard-codes 3 channels in its reshape"
    n_h, n_w = H // ph, W // pw
    x = x[:, : n_h * ph, : n_w * pw]                    # torch.unfold drops remainders

    rows = C * n_h                                      # one slab row per (channel, patch-row)
    lane_in = ph * n_w * pw
    lane_out = n_w * ph * pw                            # same count, permuted order
    slab = x.reshape(rows, lane_in)                     # contiguous row-major regrouping

    kernel = functools.partial(_patchify_kernel, n_w=n_w, ph=ph, pw=pw)
    out = pl.pallas_call(
        kernel,
        out_shape=jax.ShapeDtypeStruct((rows, lane_out), x.dtype),
        grid=(1,),                                      # whole image in one step
        in_specs=[pl.BlockSpec((rows, lane_in), lambda i: (0, 0))],
        out_specs=pl.BlockSpec((rows, lane_out), lambda i: (0, 0)),
        compiler_params=pltpu.CompilerParams(
            dimension_semantics=("arbitrary",)),
    )(slab)

    # The module's own final `.reshape(-1, pw*ph*3)`: contiguous over (c,i,j,p,q).
    return out.reshape(n_h * n_w, ph * pw * C)


if __name__ == "__main__":
    key = jax.random.PRNGKey(0)

    num_patches = 8
    image_size = 64
    C = 3
    x = jax.random.normal(key, (C, image_size, image_size), dtype=jnp.float32)

    out = patch_transform_forward(x, num_patches=num_patches, image_size=image_size)
    out = jax.block_until_ready(out)

    # pure-JAX reference of torch unfold/unfold/reshape
    ph = (2 * image_size) // num_patches
    pw = ph
    n_h, n_w = image_size // ph, image_size // pw
    xc = x[:, : n_h * ph, : n_w * pw]
    ref = (xc.reshape(C, n_h, ph, n_w, pw)
             .transpose(0, 1, 3, 2, 4)
             .reshape(-1, ph * pw * C))

    assert out.shape == (n_h * n_w, ph * pw * C)
    assert bool(jnp.all(out == ref))

    print("KERNEL_OK")
</pallas_src>

<mosaic_0001>
module attributes {stable_mosaic.version = 11 : i64} {
  func.func @_patchify_kernel(%arg0: i32, %arg1: memref<12x1024xf32, #tpu.memory_space<vmem>>, %arg2: memref<12x1024xf32, #tpu.memory_space<vmem>>) attributes {dimension_semantics = [#tpu.dimension_semantics<arbitrary>], iteration_bounds = array<i64: 1>, scalar_prefetch = 0 : i64, scratch_operands = 0 : i64, tpu.core_type = #tpu.core_type<tc>, window_params = [{pipeline_mode = #tpu.pipeline_mode<synchronous>, transform_indices = @transform_0, window_bounds = array<i64: 12, 1024>}, {pipeline_mode = #tpu.pipeline_mode<synchronous>, transform_indices = @transform_1, window_bounds = array<i64: 12, 1024>}]} {
    %c0 = arith.constant 0 : index
    %c0_0 = arith.constant 0 : index
    %0 = vector.load %arg1[%c0, %c0_0] : memref<12x1024xf32, #tpu.memory_space<vmem>>, vector<12x1024xf32>
    %1 = vector.extract_strided_slice %0 {offsets = [0, 0], sizes = [12, 16], strides = [1, 1]} : vector<12x1024xf32> to vector<12x16xf32>
    %2 = vector.extract_strided_slice %0 {offsets = [0, 64], sizes = [12, 16], strides = [1, 1]} : vector<12x1024xf32> to vector<12x16xf32>
    %3 = vector.extract_strided_slice %0 {offsets = [0, 128], sizes = [12, 16], strides = [1, 1]} : vector<12x1024xf32> to vector<12x16xf32>
    %4 = vector.extract_strided_slice %0 {offsets = [0, 192], sizes = [12, 16], strides = [1, 1]} : vector<12x1024xf32> to vector<12x16xf32>
    %5 = vector.extract_strided_slice %0 {offsets = [0, 256], sizes = [12, 16], strides = [1, 1]} : vector<12x1024xf32> to vector<12x16xf32>
    %6 = vector.extract_strided_slice %0 {offsets = [0, 320], sizes = [12, 16], strides = [1, 1]} : vector<12x1024xf32> to vector<12x16xf32>
    %7 = vector.extract_strided_slice %0 {offsets = [0, 384], sizes = [12, 16], strides = [1, 1]} : vector<12x1024xf32> to vector<12x16xf32>
    %8 = vector.extract_strided_slice %0 {offsets = [0, 448], sizes = [12, 16], strides = [1, 1]} : vector<12x1024xf32> to vector<12x16xf32>
    %9 = vector.extract_strided_slice %0 {offsets = [0, 512], sizes = [12, 16], strides = [1, 1]} : vector<12x1024xf32> to vector<12x16xf32>
    %10 = vector.extract_strided_slice %0 {offsets = [0, 576], sizes = [12, 16], strides = [1, 1]} : vector<12x1024xf32> to vector<12x16xf32>
    %11 = vector.extract_strided_slice %0 {offsets = [0, 640], sizes = [12, 16], strides = [1, 1]} : vector<12x1024xf32> to vector<12x16xf32>
    %12 = vector.extract_strided_slice %0 {offsets = [0, 704], sizes = [12, 16], strides = [1, 1]} : vector<12x1024xf32> to vector<12x16xf32>
    %13 = vector.extract_strided_slice %0 {offsets = [0, 768], sizes = [12, 16], strides = [1, 1]} : vector<12x1024xf32> to vector<12x16xf32>
    %14 = vector.extract_strided_slice %0 {offsets = [0, 832], sizes = [12, 16], strides = [1, 1]} : vector<12x1024xf32> to vector<12x16xf32>
    %15 = vector.extract_strided_slice %0 {offsets = [0, 896], sizes = [12, 16], strides = [1, 1]} : vector<12x1024xf32> to vector<12x16xf32>
    %16 = vector.extract_strided_slice %0 {offsets = [0, 960], sizes = [12, 16], strides = [1, 1]} : vector<12x1024xf32> to vector<12x16xf32>
    %17 = vector.extract_strided_slice %0 {offsets = [0, 16], sizes = [12, 16], strides = [1, 1]} : vector<12x1024xf32> to vector<12x16xf32>
    %18 = vector.extract_strided_slice %0 {offsets = [0, 80], sizes = [12, 16], strides = [1, 1]} : vector<12x1024xf32> to vector<12x16xf32>
    %19 = vector.extract_strided_slice %0 {offsets = [0, 144], sizes = [12, 16], strides = [1, 1]} : vector<12x1024xf32> to vector<12x16xf32>
    %20 = vector.extract_strided_slice %0 {offsets = [0, 208], sizes = [12, 16], strides = [1, 1]} : vector<12x1024xf32> to vector<12x16xf32>
    %21 = vector.extract_strided_slice %0 {offsets = [0, 272], sizes = [12, 16], strides = [1, 1]} : vector<12x1024xf32> to vector<12x16xf32>
    %22 = vector.extract_strided_slice %0 {offsets = [0, 336], sizes = [12, 16], strides = [1, 1]} : vector<12x1024xf32> to vector<12x16xf32>
    %23 = vector.extract_strided_slice %0 {offsets = [0, 400], sizes = [12, 16], strides = [1, 1]} : vector<12x1024xf32> to vector<12x16xf32>
    %24 = vector.extract_strided_slice %0 {offsets = [0, 464], sizes = [12, 16], strides = [1, 1]} : vector<12x1024xf32> to vector<12x16xf32>
    %25 = vector.extract_strided_slice %0 {offsets = [0, 528], sizes = [12, 16], strides = [1, 1]} : vector<12x1024xf32> to vector<12x16xf32>
    %26 = vector.extract_strided_slice %0 {offsets = [0, 592], sizes = [12, 16], strides = [1, 1]} : vector<12x1024xf32> to vector<12x16xf32>
    %27 = vector.extract_strided_slice %0 {offsets = [0, 656], sizes = [12, 16], strides = [1, 1]} : vector<12x1024xf32> to vector<12x16xf32>
    %28 = vector.extract_strided_slice %0 {offsets = [0, 720], sizes = [12, 16], strides = [1, 1]} : vector<12x1024xf32> to vector<12x16xf32>
    %29 = vector.extract_strided_slice %0 {offsets = [0, 784], sizes = [12, 16], strides = [1, 1]} : vector<12x1024xf32> to vector<12x16xf32>
    %30 = vector.extract_strided_slice %0 {offsets = [0, 848], sizes = [12, 16], strides = [1, 1]} : vector<12x1024xf32> to vector<12x16xf32>
    %31 = vector.extract_strided_slice %0 {offsets = [0, 912], sizes = [12, 16], strides = [1, 1]} : vector<12x1024xf32> to vector<12x16xf32>
    %32 = vector.extract_strided_slice %0 {offsets = [0, 976], sizes = [12, 16], strides = [1, 1]} : vector<12x1024xf32> to vector<12x16xf32>
    %33 = vector.extract_strided_slice %0 {offsets = [0, 32], sizes = [12, 16], strides = [1, 1]} : vector<12x1024xf32> to vector<12x16xf32>
    %34 = vector.extract_strided_slice %0 {offsets = [0, 96], sizes = [12, 16], strides = [1, 1]} : vector<12x1024xf32> to vector<12x16xf32>
    %35 = vector.extract_strided_slice %0 {offsets = [0, 160], sizes = [12, 16], strides = [1, 1]} : vector<12x1024xf32> to vector<12x16xf32>
    %36 = vector.extract_strided_slice %0 {offsets = [0, 224], sizes = [12, 16], strides = [1, 1]} : vector<12x1024xf32> to vector<12x16xf32>
    %37 = vector.extract_strided_slice %0 {offsets = [0, 288], sizes = [12, 16], strides = [1, 1]} : vector<12x1024xf32> to vector<12x16xf32>
    %38 = vector.extract_strided_slice %0 {offsets = [0, 352], sizes = [12, 16], strides = [1, 1]} : vector<12x1024xf32> to vector<12x16xf32>
    %39 = vector.extract_strided_slice %0 {offsets = [0, 416], sizes = [12, 16], strides = [1, 1]} : vector<12x1024xf32> to vector<12x16xf32>
    %40 = vector.extract_strided_slice %0 {offsets = [0, 480], sizes = [12, 16], strides = [1, 1]} : vector<12x1024xf32> to vector<12x16xf32>
    %41 = vector.extract_strided_slice %0 {offsets = [0, 544], sizes = [12, 16], strides = [1, 1]} : vector<12x1024xf32> to vector<12x16xf32>
    %42 = vector.extract_strided_slice %0 {offsets = [0, 608], sizes = [12, 16], strides = [1, 1]} : vector<12x1024xf32> to vector<12x16xf32>
    %43 = vector.extract_strided_slice %0 {offsets = [0, 672], sizes = [12, 16], strides = [1, 1]} : vector<12x1024xf32> to vector<12x16xf32>
    %44 = vector.extract_strided_slice %0 {offsets = [0, 736], sizes = [12, 16], strides = [1, 1]} : vector<12x1024xf32> to vector<12x16xf32>
    %45 = vector.extract_strided_slice %0 {offsets = [0, 800], sizes = [12, 16], strides = [1, 1]} : vector<12x1024xf32> to vector<12x16xf32>
    %46 = vector.extract_strided_slice %0 {offsets = [0, 864], sizes = [12, 16], strides = [1, 1]} : vector<12x1024xf32> to vector<12x16xf32>
    %47 = vector.extract_strided_slice %0 {offsets = [0, 928], sizes = [12, 16], strides = [1, 1]} : vector<12x1024xf32> to vector<12x16xf32>
    %48 = vector.extract_strided_slice %0 {offsets = [0, 992], sizes = [12, 16], strides = [1, 1]} : vector<12x1024xf32> to vector<12x16xf32>
    %49 = vector.extract_strided_slice %0 {offsets = [0, 48], sizes = [12, 16], strides = [1, 1]} : vector<12x1024xf32> to vector<12x16xf32>
    %50 = vector.extract_strided_slice %0 {offsets = [0, 112], sizes = [12, 16], strides = [1, 1]} : vector<12x1024xf32> to vector<12x16xf32>
    %51 = vector.extract_strided_slice %0 {offsets = [0, 176], sizes = [12, 16], strides = [1, 1]} : vector<12x1024xf32> to vector<12x16xf32>
    %52 = vector.extract_strided_slice %0 {offsets = [0, 240], sizes = [12, 16], strides = [1, 1]} : vector<12x1024xf32> to vector<12x16xf32>
    %53 = vector.extract_strided_slice %0 {offsets = [0, 304], sizes = [12, 16], strides = [1, 1]} : vector<12x1024xf32> to vector<12x16xf32>
    %54 = vector.extract_strided_slice %0 {offsets = [0, 368], sizes = [12, 16], strides = [1, 1]} : vector<12x1024xf32> to vector<12x16xf32>
    %55 = vector.extract_strided_slice %0 {offsets = [0, 432], sizes = [12, 16], strides = [1, 1]} : vector<12x1024xf32> to vector<12x16xf32>
    %56 = vector.extract_strided_slice %0 {offsets = [0, 496], sizes = [12, 16], strides = [1, 1]} : vector<12x1024xf32> to vector<12x16xf32>
    %57 = vector.extract_strided_slice %0 {offsets = [0, 560], sizes = [12, 16], strides = [1, 1]} : vector<12x1024xf32> to vector<12x16xf32>
    %58 = vector.extract_strided_slice %0 {offsets = [0, 624], sizes = [12, 16], strides = [1, 1]} : vector<12x1024xf32> to vector<12x16xf32>
    %59 = vector.extract_strided_slice %0 {offsets = [0, 688], sizes = [12, 16], strides = [1, 1]} : vector<12x1024xf32> to vector<12x16xf32>
    %60 = vector.extract_strided_slice %0 {offsets = [0, 752], sizes = [12, 16], strides = [1, 1]} : vector<12x1024xf32> to vector<12x16xf32>
    %61 = vector.extract_strided_slice %0 {offsets = [0, 816], sizes = [12, 16], strides = [1, 1]} : vector<12x1024xf32> to vector<12x16xf32>
    %62 = vector.extract_strided_slice %0 {offsets = [0, 880], sizes = [12, 16], strides = [1, 1]} : vector<12x1024xf32> to vector<12x16xf32>
    %63 = vector.extract_strided_slice %0 {offsets = [0, 944], sizes = [12, 16], strides = [1, 1]} : vector<12x1024xf32> to vector<12x16xf32>
    %64 = vector.extract_strided_slice %0 {offsets = [0, 1008], sizes = [12, 16], strides = [1, 1]} : vector<12x1024xf32> to vector<12x16xf32>
    %65 = tpu.concatenate %1, %2, %3, %4, %5, %6, %7, %8, %9, %10, %11, %12, %13, %14, %15, %16 in 1 : vector<12x16xf32>, vector<12x16xf32>, vector<12x16xf32>, vector<12x16xf32>, vector<12x16xf32>, vector<12x16xf32>, vector<12x16xf32>, vector<12x16xf32>, vector<12x16xf32>, vector<12x16xf32>, vector<12x16xf32>, vector<12x16xf32>, vector<12x16xf32>, vector<12x16xf32>, vector<12x16xf32>, vector<12x16xf32> -> vector<12x256xf32>
    %66 = tpu.concatenate %17, %18, %19, %20, %21, %22, %23, %24, %25, %26, %27, %28, %29, %30, %31, %32 in 1 : vector<12x16xf32>, vector<12x16xf32>, vector<12x16xf32>, vector<12x16xf32>, vector<12x16xf32>, vector<12x16xf32>, vector<12x16xf32>, vector<12x16xf32>, vector<12x16xf32>, vector<12x16xf32>, vector<12x16xf32>, vector<12x16xf32>, vector<12x16xf32>, vector<12x16xf32>, vector<12x16xf32>, vector<12x16xf32> -> vector<12x256xf32>
    %67 = tpu.concatenate %33, %34, %35, %36, %37, %38, %39, %40, %41, %42, %43, %44, %45, %46, %47, %48 in 1 : vector<12x16xf32>, vector<12x16xf32>, vector<12x16xf32>, vector<12x16xf32>, vector<12x16xf32>, vector<12x16xf32>, vector<12x16xf32>, vector<12x16xf32>, vector<12x16xf32>, vector<12x16xf32>, vector<12x16xf32>, vector<12x16xf32>, vector<12x16xf32>, vector<12x16xf32>, vector<12x16xf32>, vector<12x16xf32> -> vector<12x256xf32>
    %68 = tpu.concatenate %49, %50, %51, %52, %53, %54, %55, %56, %57, %58, %59, %60, %61, %62, %63, %64 in 1 : vector<12x16xf32>, vector<12x16xf32>, vector<12x16xf32>, vector<12x16xf32>, vector<12x16xf32>, vector<12x16xf32>, vector<12x16xf32>, vector<12x16xf32>, vector<12x16xf32>, vector<12x16xf32>, vector<12x16xf32>, vector<12x16xf32>, vector<12x16xf32>, vector<12x16xf32>, vector<12x16xf32>, vector<12x16xf32> -> vector<12x256xf32>
    %69 = tpu.concatenate %65, %66, %67, %68 in 1 : vector<12x256xf32>, vector<12x256xf32>, vector<12x256xf32>, vector<12x256xf32> -> vector<12x1024xf32>
    %c0_1 = arith.constant 0 : index
    %c0_2 = arith.constant 0 : index
    %70 = vector.load %arg2[%c0_1, %c0_2] : memref<12x1024xf32, #tpu.memory_space<vmem>>, vector<12x1024xf32>
    tpu.vector_store %arg2[%c0_1, %c0_2], %69 {strides = array<i32>} : memref<12x1024xf32, #tpu.memory_space<vmem>>, vector<12x1024xf32>,
    return
  }
  func.func @transform_0(%arg0: i32) -> (i32, i32) {
    %c0_i32 = arith.constant 0 : i32
    %c0_i32_0 = arith.constant 0 : i32
    %c0_i32_1 = arith.constant 0 : i32
    return %c0_i32, %c0_i32_0 : i32, i32
  }
  func.func @transform_1(%arg0: i32) -> (i32, i32) {
    %c0_i32 = arith.constant 0 : i32
    %c0_i32_0 = arith.constant 0 : i32
    %c0_i32_1 = arith.constant 0 : i32
    return %c0_i32, %c0_i32_0 : i32, i32
  }
}

</mosaic_0001>

<bundles_post_ra>
// kernel: tpu_custom_call.1
= control target key start
LH: loop header
LB: loop body
LE: loop exit
PB: predicated region body
PF: predicated region fallthrough
CT: control target
= control target key end

     0   :  { %6 = vsyncpa [#allocation3], 0  ;;  %s1024_s0 = inlined_call_operand.hbm [shape: f32[12,1024], index: 0, kind: input, shape index: {}]   ;;  %s1025_s1 = inlined_call_operand.hbm [shape: f32[12,1024], index: 1, kind: output, shape index: {}]  }
   0x1   :  { %7 = vsyncpa [#allocation4], 0  ;;  %s12_s8 = sshll.u32 %s1024_s0, 4  ;;  %s561_s9 = smov [#allocation2]   ;;  %s13_s8 = int_to_ptr.hbm [resolvable:$true] %s12_s8 }
   0x2   :  { %s14_s10 = sshll.u32 %s561_s9, 4  ;;  %s562_s11 = smov 1024   ;;  %s15_s10 = int_to_ptr.vmem [resolvable:$true] %s14_s10 }
   0x3   :  { %s563_s12 = smov 64  }
   0x4   :  { %20 = dma.hbm_to_vmem [thread:$0]  %s13_s8, 2048, %s15_s10, [#allocation3], %s562_s11, %s562_s11, %s563_s12  }
   0x5   :  { %557 = dma.done.wait [#allocation3], 2048  }
   0x6   :  { %558 = vsyncadd [#allocation3], 4294965248  ;;  %v587_v0 = vld [vmem:[#allocation2 + $0x8] sm:$0xff]  ;;  %v589_v1 = vld [vmem:[#allocation2] sm:$0xff]  ;;  %s564_s13 = smov 112   ;;  %s565_s0 = smov 32  }
   0x7   :  { %57 = vrot.lane.b32.xlu2 %v587_v0, %s564_s13  ;;  %51 = vrot.lane.b32.xlu1 %v587_v0, %s565_s0  ;;  %s566_s14 = smov 80   ;;  %v597_v2 = vld [vmem:[#allocation2 + $0x48] sm:$0xf]  ;;  %v599_v3 = vld [vmem:[#allocation2 + $0x40] sm:$0xf]  ;;  %v607_v4 = vld [vmem:[#allocation2 + $0x10] sm:$0xff] }
   0x8   :  { %43 = vrot.lane.b32.xlu0 %v589_v1, %s566_s14  ;;  %v609_v5 = vld [vmem:[#allocation2 + $0x50] sm:$0xf]  ;;  %s567_s15 = smov 16   ;;  %v617_v6 = vld [vmem:[#allocation2 + $0x58] sm:$0xf]  ;;  %s568_s16 = smov 96  }
   0x9   :  { %v619_v7 = vld [vmem:[#allocation2 + $0x18] sm:$0xff]  ;;  %v627_v8 = vld [vmem:[#allocation2 + $0x20] sm:$0xff]  ;;  %s569_s17 = smov 48   ;;  %v635_v9 = vld [vmem:[#allocation2 + $0x68] sm:$0xf]  ;;  %vm141_vm0 = vcmask 130048  }
   0xa   :  { %v637_v10 = vld [vmem:[#allocation2 + $0x28] sm:$0xff]  ;;  %v639_v11 = vld [vmem:[#allocation2 + $0x60] sm:$0xf]  ;;  %v647_v12 = vld [vmem:[#allocation2 + $0x30] sm:$0xff]  ;;  %vm144_vm1 = vcmask 261120   ;;  %vm147_vm2 = vcmask 392192  }
   0xb   :  { %v655_v13 = vld [vmem:[#allocation2 + $0x70] sm:$0xf]  ;;  %v663_v14 = vld [vmem:[#allocation2 + $0x38] sm:$0xff]  ;;  %vm150_vm3 = vcmask 523264   ;;  %vm153_vm4 = vcmask 654336   ;;  %vm156_vm5 = vcmask 785408  }
   0xc   :  { %v665_v15 = vld [vmem:[#allocation2 + $0x78] sm:$0xf]  ;;  %vm159_vm6 = vcmask 916480   ;;  %s570_s18 = smov [#allocation5]   ;;  %s486_s22 = sshll.u32 %s1025_s1, 4  ;;  %s487_s22 = int_to_ptr.hbm [resolvable:$true] %s486_s22 }
   0xd   :  { %s484_s19 = sshll.u32 %s570_s18, 4  ;;  %s485_s19 = int_to_ptr.vmem [resolvable:$true] %s484_s19 }
   0xf   :  { %59 = vrot.lane.b32.xlu2 %v597_v2, %s564_s13  ;;  %53 = vrot.lane.b32.xlu1 %v597_v2, %s565_s0 }
  0x10   :  { %45 = vrot.lane.b32.xlu0 %v599_v3, %s566_s14 }
  0x17   :  { %71 = vrot.lane.b32.xlu2 %v607_v4, %s567_s15  ;;  %67 = vrot.lane.b32.xlu1 %v609_v5, %s563_s12 }
  0x18   :  { %65 = vrot.lane.b32.xlu0 %v607_v4, %s563_s12 }
  0x1f   :  { %81 = vrot.lane.b32.xlu2 %v617_v6, %s568_s16  ;;  %79 = vrot.lane.b32.xlu1 %v619_v7, %s568_s16 }
  0x20   :  { %73 = vrot.lane.b32.xlu0 %v609_v5, %s567_s15 }
  0x27   :  { %93 = vrot.lane.b32.xlu2 %v627_v8, %s566_s14  ;;  %87 = vrot.lane.b32.xlu1 %v617_v6, %s569_s17 }
  0x28   :  { %85 = vrot.lane.b32.xlu0 %v619_v7, %s569_s17 }
  0x2f   :  { %103 = vrot.lane.b32.xlu2 %v635_v9, %s565_s0  ;;  %101 = vrot.lane.b32.xlu1 %v637_v10, %s565_s0 }
  0x30   :  { %95 = vrot.lane.b32.xlu0 %v639_v11, %s566_s14 }
  0x37   :  { %115 = vrot.lane.b32.xlu2 %v647_v12, %s563_s12  ;;  %109 = vrot.lane.b32.xlu1 %v635_v9, %s564_s13 }
  0x38   :  { %107 = vrot.lane.b32.xlu0 %v637_v10, %s564_s13 }
  0x3f   :  { %123 = vrot.lane.b32.xlu2 %v655_v13, %s567_s15  ;;  %121 = vrot.lane.b32.xlu1 %v647_v12, %s567_s15 }
  0x40   :  { %117 = vrot.lane.b32.xlu0 %v655_v13, %s563_s12 }
  0x47   :  { %135 = vrot.lane.b32.xlu2 %v663_v14, %s569_s17  ;;  %131 = vrot.lane.b32.xlu1 %v665_v15, %s568_s16 }
  0x48   :  { %129 = vrot.lane.b32.xlu0 %v663_v14, %s568_s16 }
  0x4f   :  { %178 = vrot.lane.b32.xlu2 %v599_v3, %s564_s13  ;;  %176 = vrot.lane.b32.xlu1 %v589_v1, %s564_s13 }
  0x50   :  { %137 = vrot.lane.b32.xlu0 %v665_v15, %s569_s17 }
  0x57   :  { %188 = vrot.lane.b32.xlu2 %v587_v0, %s567_s15  ;;  %184 = vrot.lane.b32.xlu1 %v599_v3, %s563_s12 }
  0x58   :  { %182 = vrot.lane.b32.xlu0 %v589_v1, %s563_s12 }
  0x5f   :  { %196 = vrot.lane.b32.xlu2 %v597_v2, %s568_s16  ;;  %194 = vrot.lane.b32.xlu1 %v587_v0, %s568_s16 }
  0x60   :  { %190 = vrot.lane.b32.xlu0 %v597_v2, %s567_s15 }
  0x61   :  { %v691_v16 = vpop.permute.xlu2 %57 }
  0x67   :  { %206 = vrot.lane.b32.xlu2 %v619_v7, %s566_s14  ;;  %202 = vrot.lane.b32.xlu1 %v609_v5, %s569_s17 }
  0x68   :  { %200 = vrot.lane.b32.xlu0 %v607_v4, %s569_s17 }
  0x69   :  { %v699_v17 = vpop.permute.xlu2 %59 }
  0x6f   :  { %214 = vrot.lane.b32.xlu2 %v617_v6, %s565_s0  ;;  %212 = vrot.lane.b32.xlu1 %v619_v7, %s565_s0 }
  0x70   :  { %208 = vrot.lane.b32.xlu0 %v617_v6, %s566_s14 }
  0x71   :  { %v707_v18 = vpop.permute.xlu2 %71 }
  0x77   :  { %224 = vrot.lane.b32.xlu2 %v627_v8, %s563_s12  ;;  %220 = vrot.lane.b32.xlu1 %v639_v11, %s564_s13 }
  0x78   :  { %218 = vrot.lane.b32.xlu0 %v627_v8, %s564_s13 }
  0x79   :  { %v82_v19 = vpop.permute.xlu2 %81  ;;  %v52_v20 = vpop.permute.xlu1 %51 }
  0x7a   :  { %v715_v21 = vpop.permute.xlu0 %43 }
  0x7b   :  { %v142_v29 = vsel %vm141_vm0, %v589_v1, %v715_v21 }
  0x7c   :  { %v145_v33 = vsel %vm144_vm1, %v142_v29, %v52_v20 }
  0x7d   :  { %v148_v37 = vsel %vm147_vm2, %v145_v33, %v691_v16 }
  0x7f   :  { %232 = vrot.lane.b32.xlu2 %v635_v9, %s567_s15  ;;  %230 = vrot.lane.b32.xlu1 %v637_v10, %s567_s15 }
  0x80   :  { %226 = vrot.lane.b32.xlu0 %v639_v11, %s563_s12 }
  0x81   :  { %v723_v22 = vpop.permute.xlu2 %93  ;;  %v54_v23 = vpop.permute.xlu1 %53 }
  0x82   :  { %v725_v24 = vpop.permute.xlu0 %45  ;;  %v162_v57 = vsel %vm141_vm0, %v627_v8, %v723_v22 }
  0x83   :  { %v143_v28 = vsel %vm141_vm0, %v599_v3, %v725_v24 }
  0x84   :  { %v146_v30 = vsel %vm144_vm1, %v143_v28, %v54_v23 }
  0x85   :  { %v149_v35 = vsel %vm147_vm2, %v146_v30, %v699_v17 }
  0x87   :  { %242 = vrot.lane.b32.xlu2 %v647_v12, %s569_s17  ;;  %238 = vrot.lane.b32.xlu1 %v635_v9, %s568_s16 }
  0x88   :  { %236 = vrot.lane.b32.xlu0 %v637_v10, %s568_s16 }
  0x89   :  { %v733_v25 = vpop.permute.xlu2 %103  ;;  %v68_v26 = vpop.permute.xlu1 %67 }
  0x8a   :  { %v66_v27 = vpop.permute.xlu0 %65  ;;  %v152_v36 = vsel %vm150_vm3, %v149_v35, %v68_v26 }
  0x8b   :  { %v151_v38 = vsel %vm150_vm3, %v148_v37, %v66_v27 }
  0x8c   :  { %v154_v40 = vsel %vm153_vm4, %v151_v38, %v707_v18 }
  0x8f   :  { %250 = vrot.lane.b32.xlu2 %v665_v15, %s566_s14  ;;  %248 = vrot.lane.b32.xlu1 %v663_v14, %s566_s14 }
  0x90   :  { %244 = vrot.lane.b32.xlu0 %v655_v13, %s569_s17 }
  0x91   :  { %v116_v31 = vpop.permute.xlu2 %115  ;;  %v80_v32 = vpop.permute.xlu1 %79 }
  0x92   :  { %v749_v34 = vpop.permute.xlu0 %73  ;;  %v157_v44 = vsel %vm156_vm5, %v154_v40, %v80_v32 }
  0x93   :  { %v155_v39 = vsel %vm153_vm4, %v152_v36, %v749_v34 }
  0x94   :  { %v158_v43 = vsel %vm156_vm5, %v155_v39, %v82_v19 }
  0x97   :  { %288 = vrot.lane.b32.xlu2 %v589_v1, %s568_s16  ;;  %256 = vrot.lane.b32.xlu1 %v665_v15, %s565_s0 }
  0x98   :  { %254 = vrot.lane.b32.xlu0 %v663_v14, %s565_s0 }
  0x99   :  { %v767_v41 = vpop.permute.xlu2 %123  ;;  %v769_v42 = vpop.permute.xlu1 %87 }
  0x9a   :  { %v161_v45 = vsel %vm159_vm6, %v158_v43, %v769_v42  ;;  %v775_v46 = vpop.permute.xlu0 %85 }
  0x9b   :  { %472 = vst [vmem:[#allocation5 + $0x40] sm:$0xf] %v161_v45  ;;  %v160_v47 = vsel %vm159_vm6, %v157_v44, %v775_v46 }
  0x9c   :  { %464 = vst [vmem:[#allocation5] sm:$0xff] %v160_v47 }
  0x9f   :  { %296 = vrot.lane.b32.xlu2 %v599_v3, %s569_s17  ;;  %294 = vrot.lane.b32.xlu1 %v589_v1, %s569_s17 }
  0xa0   :  { %290 = vrot.lane.b32.xlu0 %v599_v3, %s568_s16 }
  0xa1   :  { %v785_v48 = vpop.permute.xlu2 %135  ;;  %v102_v49 = vpop.permute.xlu1 %101 }
  0xa2   :  { %v787_v50 = vpop.permute.xlu0 %95  ;;  %v164_v58 = vsel %vm144_vm1, %v162_v57, %v102_v49 }
  0xa3   :  { %v163_v60 = vsel %vm141_vm0, %v639_v11, %v787_v50 }
  0xa4   :  { %v165_v26 = vsel %vm144_vm1, %v163_v60, %v733_v25 }
  0xa7   :  { %306 = vrot.lane.b32.xlu2 %v607_v4, %s565_s0  ;;  %302 = vrot.lane.b32.xlu1 %v597_v2, %s566_s14 }
  0xa8   :  { %300 = vrot.lane.b32.xlu0 %v587_v0, %s566_s14 }
  0xa9   :  { %v179_v51 = vpop.permute.xlu2 %178  ;;  %v795_v52 = vpop.permute.xlu1 %109 }
  0xaa   :  { %v797_v53 = vpop.permute.xlu0 %107  ;;  %v167_v28 = vsel %vm147_vm2, %v165_v26, %v795_v52 }
  0xab   :  { %v166_v59 = vsel %vm147_vm2, %v164_v58, %v797_v53 }
  0xac   :  { %v168_v61 = vsel %vm150_vm3, %v166_v59, %v116_v31 }
  0xaf   :  { %314 = vrot.lane.b32.xlu2 %v609_v5, %s564_s13  ;;  %312 = vrot.lane.b32.xlu1 %v607_v4, %s564_s13 }
  0xb0   :  { %308 = vrot.lane.b32.xlu0 %v609_v5, %s565_s0 }
  0xb1   :  { %v189_v54 = vpop.permute.xlu2 %188  ;;  %v805_v55 = vpop.permute.xlu1 %121 }
  0xb2   :  { %v118_v56 = vpop.permute.xlu0 %117  ;;  %v170_v19 = vsel %vm153_vm4, %v168_v61, %v805_v55 }
  0xb3   :  { %v169_v29 = vsel %vm150_vm3, %v167_v28, %v118_v56 }
  0xb4   :  { %v171_v25 = vsel %vm153_vm4, %v169_v29, %v767_v41 }
  0xb7   :  { %324 = vrot.lane.b32.xlu2 %v619_v7, %s567_s15  ;;  %320 = vrot.lane.b32.xlu1 %v617_v6, %s563_s12 }
  0xb8   :  { %318 = vrot.lane.b32.xlu0 %v619_v7, %s563_s12 }
  0xb9   :  { %v197_v62 = vpop.permute.xlu2 %196  ;;  %v132_v63 = vpop.permute.xlu1 %131 }
  0xba   :  { %v130_v20 = vpop.permute.xlu0 %129  ;;  %v173_v32 = vsel %vm156_vm5, %v171_v25, %v132_v63 }
  0xbb   :  { %v172_v23 = vsel %vm156_vm5, %v170_v19, %v130_v20 }
  0xbc   :  { %v174_v27 = vsel %vm159_vm6, %v172_v23, %v785_v48 }
  0xbd   :  { %465 = vst [vmem:[#allocation5 + $0x8] sm:$0xff] %v174_v27 }
  0xbf   :  { %332 = vrot.lane.b32.xlu2 %v639_v11, %s568_s16  ;;  %330 = vrot.lane.b32.xlu1 %v627_v8, %s568_s16 }
  0xc0   :  { %326 = vrot.lane.b32.xlu0 %v617_v6, %s567_s15 }
  0xc1   :  { %v207_v30 = vpop.permute.xlu2 %206  ;;  %v177_v31 = vpop.permute.xlu1 %176 }
  0xc2   :  { %v842_v33 = vpop.permute.xlu0 %137 }
  0xc3   :  { %v175_v35 = vsel %vm159_vm6, %v173_v32, %v842_v33 }
  0xc4   :  { %473 = vst [vmem:[#allocation5 + $0x48] sm:$0xf] %v175_v35 }
  0xc7   :  { %342 = vrot.lane.b32.xlu2 %v637_v10, %s566_s14  ;;  %338 = vrot.lane.b32.xlu1 %v639_v11, %s569_s17 }
  0xc8   :  { %336 = vrot.lane.b32.xlu0 %v627_v8, %s569_s17 }
  0xc9   :  { %v215_v36 = vpop.permute.xlu2 %214  ;;  %v185_v37 = vpop.permute.xlu1 %184 }
  0xca   :  { %v183_v38 = vpop.permute.xlu0 %182  ;;  %v261_v56 = vsel %vm141_vm0, %v179_v51, %v185_v37 }
  0xcb   :  { %v260_v44 = vsel %vm141_vm0, %v177_v31, %v183_v38 }
  0xcc   :  { %v262_v45 = vsel %vm144_vm1, %v260_v44, %v189_v54 }
  0xcf   :  { %350 = vrot.lane.b32.xlu2 %v655_v13, %s565_s0  ;;  %348 = vrot.lane.b32.xlu1 %v647_v12, %s565_s0 }
  0xd0   :  { %344 = vrot.lane.b32.xlu0 %v635_v9, %s566_s14 }
  0xd1   :  { %v225_v39 = vpop.permute.xlu2 %224  ;;  %v195_v40 = vpop.permute.xlu1 %194 }
  0xd2   :  { %v191_v43 = vpop.permute.xlu0 %190  ;;  %v264_v57 = vsel %vm147_vm2, %v262_v45, %v195_v40 }
  0xd3   :  { %v263_v59 = vsel %vm144_vm1, %v261_v56, %v191_v43 }
  0xd4   :  { %v265_v61 = vsel %vm147_vm2, %v263_v59, %v197_v62 }
  0xd7   :  { %360 = vrot.lane.b32.xlu2 %v663_v14, %s563_s12  ;;  %356 = vrot.lane.b32.xlu1 %v655_v13, %s564_s13 }
  0xd8   :  { %354 = vrot.lane.b32.xlu0 %v647_v12, %s564_s13 }
  0xd9   :  { %v233_v47 = vpop.permute.xlu2 %232  ;;  %v203_v49 = vpop.permute.xlu1 %202 }
  0xda   :  { %v201_v58 = vpop.permute.xlu0 %200  ;;  %v267_v19 = vsel %vm150_vm3, %v265_v61, %v203_v49 }
  0xdb   :  { %v266_v60 = vsel %vm150_vm3, %v264_v57, %v201_v58  ;;  %v269_v23 = vsel %vm153_vm4, %v267_v19, %v609_v5 }
  0xdc   :  { %v268_v63 = vsel %vm153_vm4, %v266_v60, %v607_v4 }
  0xdd   :  { %v270_v20 = vsel %vm156_vm5, %v268_v63, %v207_v30 }
  0xdf   :  { %418 = vrot.lane.b32.xlu2 %v627_v8, %s565_s0  ;;  %402 = vrot.lane.b32.xlu1 %v599_v3, %s565_s0 }
  0xe0   :  { %400 = vrot.lane.b32.xlu0 %v589_v1, %s565_s0 }
  0xe1   :  { %v243_v51 = vpop.permute.xlu2 %242  ;;  %v213_v54 = vpop.permute.xlu1 %212 }
  0xe2   :  { %v272_v62 = vsel %vm159_vm6, %v270_v20, %v213_v54  ;;  %v209_v26 = vpop.permute.xlu0 %208 }
  0xe3   :  { %466 = vst [vmem:[#allocation5 + $0x10] sm:$0xff] %v272_v62  ;;  %v271_v27 = vsel %vm156_vm5, %v269_v23, %v209_v26 }
  0xe4   :  { %v273_v8 = vsel %vm159_vm6, %v271_v27, %v215_v36 }
  0xe5   :  { %474 = vst [vmem:[#allocation5 + $0x50] sm:$0xf] %v273_v8 }
  0xe7   :  { %406 = vrot.lane.b32.xlu1 %v587_v0, %s563_s12  ;;  %408 = vrot.lane.b32.xlu2 %v597_v2, %s563_s12 }
  0xe8   :  { %420 = vrot.lane.b32.xlu0 %v639_v11, %s565_s0 }
  0xe9   :  { %v251_v1 = vpop.permute.xlu2 %250  ;;  %v221_v3 = vpop.permute.xlu1 %220 }
  0xea   :  { %v219_v28 = vpop.permute.xlu0 %218 }
  0xeb   :  { %v274_v35 = vsel %vm141_vm0, %v219_v28, %v225_v39 }
  0xef   :  { %426 = vrot.lane.b32.xlu1 %v635_v9, %s563_s12  ;;  %412 = vrot.lane.b32.xlu2 %v607_v4, %s568_s16 }
  0xf0   :  { %424 = vrot.lane.b32.xlu0 %v637_v10, %s563_s12 }
  0xf1   :  { %v289_v29 = vpop.permute.xlu2 %288  ;;  %v231_v25 = vpop.permute.xlu1 %230 }
  0xf2   :  { %v227_v30 = vpop.permute.xlu0 %226  ;;  %v276_v38 = vsel %vm144_vm1, %v274_v35, %v231_v25 }
  0xf3   :  { %v275_v4 = vsel %vm141_vm0, %v221_v3, %v227_v30 }
  0xf4   :  { %v277_v36 = vsel %vm144_vm1, %v275_v4, %v233_v47 }
  0xf7   :  { %430 = vrot.lane.b32.xlu1 %v647_v12, %s568_s16  ;;  %432 = vrot.lane.b32.xlu2 %v655_v13, %s568_s16 }
  0xf8   :  { %414 = vrot.lane.b32.xlu0 %v609_v5, %s568_s16 }
  0xf9   :  { %v297_v11 = vpop.permute.xlu2 %296  ;;  %v239_v31 = vpop.permute.xlu1 %238 }
  0xfa   :  { %v237_v32 = vpop.permute.xlu0 %236  ;;  %v279_v40 = vsel %vm147_vm2, %v277_v36, %v239_v31 }
  0xfb   :  { %v278_v44 = vsel %vm147_vm2, %v276_v38, %v237_v32 }
  0xfc   :  { %v280_v49 = vsel %vm150_vm3, %v278_v44, %v243_v51 }
  0xfd   :  { %v282_v39 = vsel %vm153_vm4, %v280_v49, %v647_v12 }
  0xff   :  { %366 = vrot.lane.b32.xlu1 %v663_v14, %s567_s15  ;;  %368 = vrot.lane.b32.xlu2 %v665_v15, %s567_s15 }
 0x100   :  { %362 = vrot.lane.b32.xlu0 %v665_v15, %s563_s12 }
 0x101   :  { %v307_v37 = vpop.permute.xlu2 %306  ;;  %v249_v5 = vpop.permute.xlu1 %248 }
 0x102   :  { %v245_v43 = vpop.permute.xlu0 %244  ;;  %v284_v59 = vsel %vm156_vm5, %v282_v39, %v249_v5 }
 0x103   :  { %v281_v45 = vsel %vm150_vm3, %v279_v40, %v245_v43 }
 0x104   :  { %v283_v56 = vsel %vm153_vm4, %v281_v45, %v655_v13 }
 0x105   :  { %v285_v58 = vsel %vm156_vm5, %v283_v56, %v251_v1 }
 0x109   :  { %v315_v47 = vpop.permute.xlu2 %314  ;;  %v257_v57 = vpop.permute.xlu1 %256 }
 0x10a   :  { %v287_v60 = vsel %vm159_vm6, %v285_v58, %v257_v57  ;;  %v255_v61 = vpop.permute.xlu0 %254 }
 0x10b   :  { %475 = vst [vmem:[#allocation5 + $0x58] sm:$0xf] %v287_v60  ;;  %v286_v63 = vsel %vm159_vm6, %v284_v59, %v255_v61 }
 0x10c   :  { %467 = vst [vmem:[#allocation5 + $0x18] sm:$0xff] %v286_v63 }
 0x111   :  { %v295_v19 = vpop.permute.xlu1 %294  ;;  %v325_v54 = vpop.permute.xlu2 %324 }
 0x112   :  { %v291_v51 = vpop.permute.xlu0 %290  ;;  %v372_v23 = vsel %vm141_vm0, %v289_v29, %v295_v19 }
 0x113   :  { %v374_v27 = vsel %vm144_vm1, %v372_v23, %v587_v0  ;;  %v373_v3 = vsel %vm141_vm0, %v291_v51, %v297_v11 }
 0x114   :  { %v375_v29 = vsel %vm144_vm1, %v373_v3, %v597_v2 }
 0x119   :  { %v303_v13 = vpop.permute.xlu1 %302  ;;  %v926_v62 = vpop.permute.xlu2 %332 }
 0x11a   :  { %v301_v20 = vpop.permute.xlu0 %300  ;;  %v377_v0 = vsel %vm147_vm2, %v375_v29, %v303_v13 }
 0x11b   :  { %v376_v8 = vsel %vm147_vm2, %v374_v27, %v301_v20 }
 0x11c   :  { %v378_v28 = vsel %vm150_vm3, %v376_v8, %v307_v37 }
 0x121   :  { %v313_v12 = vpop.permute.xlu1 %312  ;;  %v932_v1 = vpop.permute.xlu2 %342 }
 0x122   :  { %v309_v26 = vpop.permute.xlu0 %308  ;;  %v380_v30 = vsel %vm153_vm4, %v378_v28, %v313_v12 }
 0x123   :  { %v379_v35 = vsel %vm150_vm3, %v377_v0, %v309_v26 }
 0x124   :  { %v381_v11 = vsel %vm153_vm4, %v379_v35, %v315_v47 }
 0x129   :  { %v321_v25 = vpop.permute.xlu1 %320  ;;  %v943_v36 = vpop.permute.xlu2 %350 }
 0x12a   :  { %v319_v31 = vpop.permute.xlu0 %318  ;;  %v383_v5 = vsel %vm156_vm5, %v381_v11, %v321_v25 }
 0x12b   :  { %v382_v32 = vsel %vm156_vm5, %v380_v30, %v319_v31 }
 0x12c   :  { %v384_v4 = vsel %vm159_vm6, %v382_v32, %v325_v54 }
 0x12d   :  { %468 = vst [vmem:[#allocation5 + $0x20] sm:$0xff] %v384_v4 }
 0x131   :  { %v331_v37 = vpop.permute.xlu1 %330  ;;  %v948_v44 = vpop.permute.xlu2 %360 }
 0x132   :  { %v327_v38 = vpop.permute.xlu0 %326 }
 0x133   :  { %v385_v40 = vsel %vm159_vm6, %v383_v5, %v327_v38 }
 0x134   :  { %476 = vst [vmem:[#allocation5 + $0x60] sm:$0xf] %v385_v40 }
 0x139   :  { %v339_v43 = vpop.permute.xlu1 %338  ;;  %v419_v56 = vpop.permute.xlu2 %418 }
 0x13a   :  { %v337_v2 = vpop.permute.xlu0 %336  ;;  %v450_v8 = vsel %vm141_vm0, %v723_v22, %v419_v56 }
 0x13b   :  { %v386_v25 = vsel %vm141_vm0, %v331_v37, %v337_v2 }
 0x141   :  { %v349_v45 = vpop.permute.xlu1 %348  ;;  %v409_v58 = vpop.permute.xlu2 %408 }
 0x142   :  { %v345_v49 = vpop.permute.xlu0 %344 }
 0x149   :  { %v357_v39 = vpop.permute.xlu1 %356  ;;  %v413_v61 = vpop.permute.xlu2 %412 }
 0x14a   :  { %v355_v57 = vpop.permute.xlu0 %354 }
 0x151   :  { %v403_v59 = vpop.permute.xlu1 %402 }
 0x152   :  { %v401_v60 = vpop.permute.xlu0 %400 }
 0x153   :  { %v436_v47 = vsel %vm141_vm0, %v715_v21, %v401_v60 }
 0x154   :  { %v438_v19 = vsel %vm144_vm1, %v436_v47, %v691_v16  ;;  %v437_v16 = vsel %vm141_vm0, %v725_v24, %v403_v59  ;;  %v452_v24 = vsel %vm144_vm1, %v450_v8, %v797_v53 }
 0x159   :  { %v407_v63 = vpop.permute.xlu1 %406 }
 0x15a   :  { %v440_v51 = vsel %vm147_vm2, %v438_v19, %v407_v63  ;;  %v421_v54 = vpop.permute.xlu0 %420 }
 0x15b   :  { %v442_v13 = vsel %vm150_vm3, %v440_v51, %v707_v18  ;;  %v451_v23 = vsel %vm141_vm0, %v787_v50, %v421_v54  ;;  %v433_v18 = vpop.permute.xlu2 %432 }
 0x15c   :  { %v444_v20 = vsel %vm153_vm4, %v442_v13, %v413_v61  ;;  %v453_v27 = vsel %vm144_vm1, %v451_v23, %v795_v52 }
 0x15d   :  { %v446_v12 = vsel %vm156_vm5, %v444_v20, %v775_v46 }
 0x15e   :  { %v448_v21 = vsel %vm159_vm6, %v446_v12, %v619_v7  ;;  %v439_v7 = vsel %vm144_vm1, %v437_v16, %v699_v17  ;;  %v388_v17 = vsel %vm144_vm1, %v386_v25, %v637_v10 }
 0x15f   :  { %470 = vst [vmem:[#allocation5 + $0x30] sm:$0xff] %v448_v21  ;;  %v390_v10 = vsel %vm147_vm2, %v388_v17, %v932_v1 }
 0x160   :  { %v392_v35 = vsel %vm150_vm3, %v390_v10, %v349_v45 }
 0x161   :  { %v427_v26 = vpop.permute.xlu1 %426  ;;  %v394_v37 = vsel %vm153_vm4, %v392_v35, %v355_v57 }
 0x162   :  { %v455_v46 = vsel %vm147_vm2, %v453_v27, %v427_v26  ;;  %v425_v3 = vpop.permute.xlu0 %424 }
 0x163   :  { %v457_v50 = vsel %vm150_vm3, %v455_v46, %v767_v41  ;;  %v454_v22 = vsel %vm147_vm2, %v452_v24, %v425_v3  ;;  %v441_v41 = vsel %vm147_vm2, %v439_v7, %v409_v58  ;;  %v369_v1 = vpop.permute.xlu2 %368 }
 0x164   :  { %v459_v28 = vsel %vm153_vm4, %v457_v50, %v433_v18  ;;  %v456_v53 = vsel %vm150_vm3, %v454_v22, %v805_v55  ;;  %v443_v29 = vsel %vm150_vm3, %v441_v41, %v749_v34 }
 0x165   :  { %v461_v52 = vsel %vm156_vm5, %v459_v28, %v842_v33  ;;  %v387_v33 = vsel %vm141_vm0, %v926_v62, %v339_v43 }
 0x166   :  { %v463_v30 = vsel %vm159_vm6, %v461_v52, %v665_v15  ;;  %v389_v34 = vsel %vm144_vm1, %v387_v33, %v635_v9  ;;  %v396_v9 = vsel %vm156_vm5, %v394_v37, %v948_v44 }
 0x167   :  { %479 = vst [vmem:[#allocation5 + $0x78] sm:$0xf] %v463_v30  ;;  %v391_v11 = vsel %vm147_vm2, %v389_v34, %v345_v49 }
 0x169   :  { %v431_v31 = vpop.permute.xlu1 %430 }
 0x16a   :  { %v458_v32 = vsel %vm153_vm4, %v456_v53, %v431_v31  ;;  %v415_v4 = vpop.permute.xlu0 %414 }
 0x16b   :  { %v460_v15 = vsel %vm156_vm5, %v458_v32, %v785_v48  ;;  %v445_v0 = vsel %vm153_vm4, %v443_v29, %v415_v4 }
 0x16c   :  { %v462_v55 = vsel %vm159_vm6, %v460_v15, %v663_v14  ;;  %v447_v62 = vsel %vm156_vm5, %v445_v0, %v769_v42  ;;  %v393_v14 = vsel %vm150_vm3, %v391_v11, %v943_v36 }
 0x16d   :  { %471 = vst [vmem:[#allocation5 + $0x38] sm:$0xff] %v462_v55  ;;  %v449_v48 = vsel %vm159_vm6, %v447_v62, %v617_v6  ;;  %v395_v6 = vsel %vm153_vm4, %v393_v14, %v357_v39 }
 0x16e   :  { %478 = vst [vmem:[#allocation5 + $0x70] sm:$0xf] %v449_v48 }
 0x171   :  { %v367_v42 = vpop.permute.xlu1 %366 }
 0x172   :  { %v398_v5 = vsel %vm159_vm6, %v396_v9, %v367_v42  ;;  %v363_v38 = vpop.permute.xlu0 %362 }
 0x173   :  { %469 = vst [vmem:[#allocation5 + $0x28] sm:$0xff] %v398_v5  ;;  %v397_v40 = vsel %vm156_vm5, %v395_v6, %v363_v38 }
 0x174   :  { %v399_v43 = vsel %vm159_vm6, %v397_v40, %v369_v1 }
 0x175   :  { %477 = vst [vmem:[#allocation5 + $0x68] sm:$0xf] %v399_v43 }
 0x176   :  { %492 = dma.vmem_to_hbm [thread:$0]  %s485_s19, 2048, %s487_s22, [#allocation4], %s562_s11, %s562_s11, %s563_s12  }
 0x177   :  { %559 = dma.done.wait [#allocation4], 2048  }
 0x178   :  { %560 = vsyncadd [#allocation4], 4294965248 }
 0x179   :  { %497 = vsyncpa [#allocation3], 1 }
 0x17a   :  { %498 = vsyncpa [#allocation4], 1 }

</bundles_post_ra>
